<compile_context>
chip_gen: v7x
topology: tpu7x:2x2x1
jax: 0.10.0
libtpu: 0.0.40
codegen_flags: <defaults>
</compile_context>

<pallas_src>
import functools

import jax
import jax.numpy as jnp
from jax.experimental import pallas as pl
from jax.experimental.pallas import tpu as pltpu

EPS = 1e-5


# ---------------------------------------------------------------------------
# Pass 1: attention gate + W conv, streamed over spatial tiles.
#   x (N,Cin,HW), g (N,Cg,HW)  ->  wy (N,Cin,HW), attn (N,1,HW),
#   s1 (Cin,1) = sum_m wy[:,m],  s2 (Cin,Cin) = sum_m wy[:,m] wy[:,m]^T
# ---------------------------------------------------------------------------
def _pass1_kernel(x_ref, g_ref,
                  theta_w_ref, phi_w_ref, phi_b_ref,
                  psi_w_ref, psi_b_ref,
                  w_w_ref, w_b_ref,
                  wy_ref, attn_ref, s1_ref, s2_ref):
    x = x_ref[0]                                  # (Cin, T)
    g = g_ref[0]                                  # (Cg,  T)

    theta_x = jnp.dot(theta_w_ref[...], x, preferred_element_type=jnp.float32)
    phi_g = (jnp.dot(phi_w_ref[...], g, preferred_element_type=jnp.float32)
             + phi_b_ref[...])
    f = jnp.maximum(theta_x + phi_g, 0.0)                        # (inter, T)
    psi_f = (jnp.dot(psi_w_ref[...], f, preferred_element_type=jnp.float32)
             + psi_b_ref[...])                                   # (1, T)
    attn = jax.nn.sigmoid(psi_f)                                 # (1, T) lane-dense
    y = attn * x                                                 # (Cin, T)
    wy = (jnp.dot(w_w_ref[...], y, preferred_element_type=jnp.float32)
          + w_b_ref[...])                                        # (Cin, T)

    wy_ref[0] = wy
    attn_ref[0] = attn

    # Global BatchNorm statistics accumulated across the whole grid in
    # VMEM-resident output blocks (constant index_map over both grid axes).
    @pl.when((pl.program_id(0) == 0) & (pl.program_id(1) == 0))
    def _():
        s1_ref[...] = jnp.zeros_like(s1_ref)
        s2_ref[...] = jnp.zeros_like(s2_ref)

    s1_ref[...] += jnp.sum(wy, axis=1, keepdims=True)
    s2_ref[...] += jax.lax.dot_general(
        wy, wy, (((1,), (1,)), ((), ())), preferred_element_type=jnp.float32)


# ---------------------------------------------------------------------------
# Pass 2: folded (BN1 -> combine_gates conv -> BN2 -> ReLU) as one per-pixel
# affine + ReLU.
# ---------------------------------------------------------------------------
def _pass2_kernel(wy_ref, a2_ref, c2_ref, out_ref):
    out_ref[0] = jnp.maximum(
        jnp.dot(a2_ref[...], wy_ref[0], preferred_element_type=jnp.float32)
        + c2_ref[...], 0.0)


def _pick_tile(hw, target):
    """Largest multiple of 128 <= target that divides HW (or HW itself)."""
    if hw % 128 != 0:
        return hw
    t = max(128, (min(target, hw) // 128) * 128)
    while hw % t != 0:
        t -= 128
    return t


@functools.partial(jax.jit, static_argnames=("tile_hw",))
def multi_attention_block(x_nchw, g_nchw, params, tile_hw=2048):
    """x: (N, Cin, H, W), g: (N, Cg, H, W). Returns (out NCHW, attn NCHW).

    Conv weights are stored (C_out, C_in) (PyTorch 1x1-conv layout, squeezed);
    biases and BN gamma/beta are (C, 1) columns (lane-broadcast inside kernels).
    """
    N, Cin, H, W = x_nchw.shape
    Cg = g_nchw.shape[1]
    HW = H * W
    M = N * HW
    inter = params["theta_w"].shape[0]

    x = x_nchw.reshape(N, Cin, HW)        # NCHW -> (N, C, HW): no data movement
    g = g_nchw.reshape(N, Cg, HW)

    tile = _pick_tile(HW, tile_hw)
    grid = (N, HW // tile)

    def const_spec(shape):
        return pl.BlockSpec(shape, lambda n, t: (0,) * len(shape))

    # Rough double-buffered f32 VMEM footprint of the streamed blocks.
    est = 2 * 4 * tile * (3 * Cin + Cg + 1)
    vmem_limit = int(min(max(2 * est + (4 << 20), 16 << 20), 32 << 20))

    # ---- pass 1: attention gate + W conv + global BN statistics ------------
    wy, attn, s1, s2 = pl.pallas_call(
        _pass1_kernel,
        grid=grid,
        in_specs=[
            pl.BlockSpec((1, Cin, tile), lambda n, t: (n, 0, t)),
            pl.BlockSpec((1, Cg, tile), lambda n, t: (n, 0, t)),
            const_spec((inter, Cin)),      # theta_w
            const_spec((inter, Cg)),       # phi_w
            const_spec((inter, 1)),        # phi_b
            const_spec((1, inter)),        # psi_w
            const_spec((1, 1)),            # psi_b
            const_spec((Cin, Cin)),        # W_w
            const_spec((Cin, 1)),          # W_b
        ],
        out_specs=(
            pl.BlockSpec((1, Cin, tile), lambda n, t: (n, 0, t)),
            pl.BlockSpec((1, 1, tile), lambda n, t: (n, 0, t)),
            const_spec((Cin, 1)),
            const_spec((Cin, Cin)),
        ),
        out_shape=(
            jax.ShapeDtypeStruct((N, Cin, HW), jnp.float32),
            jax.ShapeDtypeStruct((N, 1, HW), jnp.float32),
            jax.ShapeDtypeStruct((Cin, 1), jnp.float32),
            jax.ShapeDtypeStruct((Cin, Cin), jnp.float32),
        ),
        compiler_params=pltpu.CompilerParams(
            dimension_semantics=("arbitrary", "arbitrary"),
            vmem_limit_bytes=vmem_limit),
    )(x, g,
      params["theta_w"], params["phi_w"], params["phi_b"],
      params["psi_w"], params["psi_b"],
      params["W_w"], params["W_b"])

    # ---- host-side folding of both BatchNorms (exact global train-mode stats)
    mu1 = s1 / M                                              # (Cin, 1)
    var1 = jnp.maximum(jnp.diagonal(s2)[:, None] / M - mu1 * mu1, 0.0)
    a1 = params["W_gamma"] * jax.lax.rsqrt(var1 + EPS)        # BN1 scale
    b1 = params["W_beta"] - mu1 * a1                          # BN1 shift

    # combine_gates conv applied to BN1-affine of wy:  cz = A @ wy + c
    A = params["cg_w"] * a1.T                                 # scale columns
    c = params["cg_w"] @ b1 + params["cg_b"]                  # (Cin, 1)

    # BN2 statistics of cz follow analytically from the moments of wy.
    mean2 = A @ mu1 + c
    cov = s2 / M - mu1 @ mu1.T
    var2 = jnp.maximum(jnp.sum((A @ cov) * A, axis=1, keepdims=True), 0.0)
    sc2 = params["cg_gamma"] * jax.lax.rsqrt(var2 + EPS)
    A2 = A * sc2                                              # scale rows
    c2 = (c - mean2) * sc2 + params["cg_beta"]

    # ---- pass 2: out = relu(A2 @ wy + c2), fully parallel -------------------
    out = pl.pallas_call(
        _pass2_kernel,
        grid=grid,
        in_specs=[
            pl.BlockSpec((1, Cin, tile), lambda n, t: (n, 0, t)),
            const_spec((Cin, Cin)),
            const_spec((Cin, 1)),
        ],
        out_specs=pl.BlockSpec((1, Cin, tile), lambda n, t: (n, 0, t)),
        out_shape=jax.ShapeDtypeStruct((N, Cin, HW), jnp.float32),
        compiler_params=pltpu.CompilerParams(
            dimension_semantics=("parallel", "parallel"),
            vmem_limit_bytes=vmem_limit),
    )(wy, A2, c2)

    return out.reshape(N, Cin, H, W), attn.reshape(N, 1, H, W)


# ---------------------------------------------------------------------------
# Pure-JAX reference (PyTorch semantics: 1x1 convs + train-mode BatchNorm).
# ---------------------------------------------------------------------------
def _reference(x, g, p):
    def conv1x1(inp, w, b=None):
        out = jnp.einsum('oi,nihw->nohw', w, inp)
        if b is not None:
            out = out + b.reshape(1, -1, 1, 1)
        return out

    def bn(z, gamma, beta):
        mu = jnp.mean(z, axis=(0, 2, 3), keepdims=True)
        var = jnp.mean((z - mu) ** 2, axis=(0, 2, 3), keepdims=True)
        return ((z - mu) * jax.lax.rsqrt(var + EPS)
                * gamma.reshape(1, -1, 1, 1) + beta.reshape(1, -1, 1, 1))

    theta = conv1x1(x, p["theta_w"])
    phi = conv1x1(g, p["phi_w"], p["phi_b"])
    f = jnp.maximum(theta + phi, 0.0)
    attn = jax.nn.sigmoid(conv1x1(f, p["psi_w"], p["psi_b"]))
    y = attn * x
    wy = conv1x1(y, p["W_w"], p["W_b"])
    gated = bn(wy, p["W_gamma"], p["W_beta"])
    cz = conv1x1(gated, p["cg_w"], p["cg_b"])
    out = jnp.maximum(bn(cz, p["cg_gamma"], p["cg_beta"]), 0.0)
    return out, attn


def init_params(key, in_size, gate_size, inter_size):
    """Synthetic parameters. Conv weights stored (C_out, C_in); vectors (C, 1)."""
    ks = jax.random.split(key, 8)

    def he(k, cout, cin):
        return jax.random.normal(k, (cout, cin), jnp.float32) * jnp.sqrt(2.0 / cin)

    return {
        # GridAttentionBlock ('concatenation' mode, sub_sample_factor=(1,1))
        "theta_w": he(ks[0], inter_size, in_size),                       # no bias
        "phi_w": he(ks[1], inter_size, gate_size),
        "phi_b": 0.01 * jnp.ones((inter_size, 1), jnp.float32),
        "psi_w": he(ks[2], 1, inter_size),
        "psi_b": jnp.zeros((1, 1), jnp.float32),
        "W_w": he(ks[3], in_size, in_size),
        "W_b": 0.02 * jnp.ones((in_size, 1), jnp.float32),
        "W_gamma": 1.0 + 0.02 * jax.random.normal(ks[4], (in_size, 1), jnp.float32),
        "W_beta": jnp.zeros((in_size, 1), jnp.float32),
        # combine_gates
        "cg_w": he(ks[5], in_size, in_size),
        "cg_b": 0.03 * jnp.ones((in_size, 1), jnp.float32),
        "cg_gamma": 1.0 + 0.02 * jax.random.normal(ks[6], (in_size, 1), jnp.float32),
        "cg_beta": jnp.zeros((in_size, 1), jnp.float32),
    }


if __name__ == "__main__":
    # Small shapes consistent with the module (sub_sample_factor=(1,1)).
    N, H, W = 2, 16, 16
    in_size, gate_size, inter_size = 8, 16, 4

    key = jax.random.PRNGKey(0)
    kx, kg, kp = jax.random.split(key, 3)
    x = jax.random.normal(kx, (N, in_size, H, W), jnp.float32)     # NCHW like PyTorch
    g = jax.random.normal(kg, (N, gate_size, H, W), jnp.float32)   # gating signal
    params = init_params(kp, in_size, gate_size, inter_size)

    # tile_hw=128 -> grid (2, 2): exercises multi-tile streaming and the
    # cross-tile global BatchNorm statistics accumulation.
    out, attn = multi_attention_block(x, g, params, tile_hw=128)
    out = jax.block_until_ready(out)
    attn = jax.block_until_ready(attn)

    ref_out, ref_attn = _reference(x, g, params)
    assert out.shape == (N, in_size, H, W) and attn.shape == (N, 1, H, W)
    assert jnp.allclose(out, ref_out, rtol=1e-3, atol=1e-3)
    assert jnp.allclose(attn, ref_attn, rtol=1e-3, atol=1e-3)

    print("KERNEL_OK")
</pallas_src>

<mosaic_0001>
module attributes {stable_mosaic.version = 11 : i64} {
  func.func @_pass1_kernel(%arg0: i32, %arg1: i32, %arg2: memref<1x8x128xf32, #tpu.memory_space<vmem>>, %arg3: memref<1x16x128xf32, #tpu.memory_space<vmem>>, %arg4: memref<4x8xf32, #tpu.memory_space<vmem>>, %arg5: memref<4x16xf32, #tpu.memory_space<vmem>>, %arg6: memref<4x1xf32, #tpu.memory_space<vmem>>, %arg7: memref<1x4xf32, #tpu.memory_space<vmem>>, %arg8: memref<1x1xf32, #tpu.memory_space<vmem>>, %arg9: memref<8x8xf32, #tpu.memory_space<vmem>>, %arg10: memref<8x1xf32, #tpu.memory_space<vmem>>, %arg11: memref<1x8x128xf32, #tpu.memory_space<vmem>>, %arg12: memref<1x1x128xf32, #tpu.memory_space<vmem>>, %arg13: memref<8x1xf32, #tpu.memory_space<vmem>>, %arg14: memref<8x8xf32, #tpu.memory_space<vmem>>) attributes {dimension_semantics = [#tpu.dimension_semantics<arbitrary>, #tpu.dimension_semantics<arbitrary>], iteration_bounds = array<i64: 2, 2>, scalar_prefetch = 0 : i64, scratch_operands = 0 : i64, tpu.core_type = #tpu.core_type<tc>, window_params = [{transform_indices = @transform_0, window_bounds = array<i64: 1, 8, 128>}, {transform_indices = @transform_1, window_bounds = array<i64: 1, 16, 128>}, {pipeline_mode = #tpu.pipeline_mode<synchronous>, transform_indices = @transform_2, window_bounds = array<i64: 4, 8>}, {pipeline_mode = #tpu.pipeline_mode<synchronous>, transform_indices = @transform_3, window_bounds = array<i64: 4, 16>}, {pipeline_mode = #tpu.pipeline_mode<synchronous>, transform_indices = @transform_4, window_bounds = array<i64: 4, 1>}, {pipeline_mode = #tpu.pipeline_mode<synchronous>, transform_indices = @transform_5, window_bounds = array<i64: 1, 4>}, {pipeline_mode = #tpu.pipeline_mode<synchronous>, transform_indices = @transform_6, window_bounds = array<i64: 1, 1>}, {pipeline_mode = #tpu.pipeline_mode<synchronous>, transform_indices = @transform_7, window_bounds = array<i64: 8, 8>}, {pipeline_mode = #tpu.pipeline_mode<synchronous>, transform_indices = @transform_8, window_bounds = array<i64: 8, 1>}, {transform_indices = @transform_9, window_bounds = array<i64: 1, 8, 128>}, {transform_indices = @transform_10, window_bounds = array<i64: 1, 1, 128>}, {pipeline_mode = #tpu.pipeline_mode<synchronous>, transform_indices = @transform_11, window_bounds = array<i64: 8, 1>}, {pipeline_mode = #tpu.pipeline_mode<synchronous>, transform_indices = @transform_12, window_bounds = array<i64: 8, 8>}]} {
    %c0 = arith.constant 0 : index
    %c0_0 = arith.constant 0 : index
    %c0_1 = arith.constant 0 : index
    %0 = vector.load %arg2[%c0, %c0_0, %c0_1] : memref<1x8x128xf32, #tpu.memory_space<vmem>>, vector<1x8x128xf32>
    %1 = vector.shape_cast %0 : vector<1x8x128xf32> to vector<8x128xf32>
    %c0_2 = arith.constant 0 : index
    %c0_3 = arith.constant 0 : index
    %c0_4 = arith.constant 0 : index
    %2 = vector.load %arg3[%c0_2, %c0_3, %c0_4] : memref<1x16x128xf32, #tpu.memory_space<vmem>>, vector<1x16x128xf32>
    %3 = vector.shape_cast %2 : vector<1x16x128xf32> to vector<16x128xf32>
    %c0_5 = arith.constant 0 : index
    %c0_6 = arith.constant 0 : index
    %4 = vector.load %arg4[%c0_5, %c0_6] : memref<4x8xf32, #tpu.memory_space<vmem>>, vector<4x8xf32>
    %cst = arith.constant dense<0.000000e+00> : vector<4x128xf32>
    %5 = tpu.matmul %4, %1, %cst {dimension_numbers = #tpu.dot_dimension_numbers<[1], [0], [0], [1], [0, 0, 1, 1], [], []>} : vector<4x8xf32>, vector<8x128xf32>, vector<4x128xf32> -> vector<4x128xf32>
    %c0_7 = arith.constant 0 : index
    %c0_8 = arith.constant 0 : index
    %6 = vector.load %arg5[%c0_7, %c0_8] : memref<4x16xf32, #tpu.memory_space<vmem>>, vector<4x16xf32>
    %cst_9 = arith.constant dense<0.000000e+00> : vector<4x128xf32>
    %7 = tpu.matmul %6, %3, %cst_9 {dimension_numbers = #tpu.dot_dimension_numbers<[1], [0], [0], [1], [0, 0, 1, 1], [], []>} : vector<4x16xf32>, vector<16x128xf32>, vector<4x128xf32> -> vector<4x128xf32>
    %c0_10 = arith.constant 0 : index
    %c0_11 = arith.constant 0 : index
    %8 = vector.load %arg6[%c0_10, %c0_11] : memref<4x1xf32, #tpu.memory_space<vmem>>, vector<4x1xf32>
    %9 = vector.broadcast %8 : vector<4x1xf32> to vector<4x128xf32>
    %10 = arith.addf %7, %9 : vector<4x128xf32>
    %11 = arith.addf %5, %10 : vector<4x128xf32>
    %cst_12 = arith.constant 0.000000e+00 : f32
    %12 = vector.broadcast %cst_12 : f32 to vector<4x128xf32>
    %13 = arith.maximumf %11, %12 : vector<4x128xf32>
    %c0_13 = arith.constant 0 : index
    %c0_14 = arith.constant 0 : index
    %14 = vector.load %arg7[%c0_13, %c0_14] : memref<1x4xf32, #tpu.memory_space<vmem>>, vector<1x4xf32>
    %cst_15 = arith.constant dense<0.000000e+00> : vector<1x128xf32>
    %15 = tpu.matmul %14, %13, %cst_15 {dimension_numbers = #tpu.dot_dimension_numbers<[1], [0], [0], [1], [0, 0, 1, 1], [], []>} : vector<1x4xf32>, vector<4x128xf32>, vector<1x128xf32> -> vector<1x128xf32>
    %c0_16 = arith.constant 0 : index
    %c0_17 = arith.constant 0 : index
    %16 = vector.load %arg8[%c0_16, %c0_17] : memref<1x1xf32, #tpu.memory_space<vmem>>, vector<1x1xf32>
    %17 = vector.broadcast %16 : vector<1x1xf32> to vector<1x128xf32>
    %18 = arith.addf %15, %17 : vector<1x128xf32>
    %19 = arith.negf %18 : vector<1x128xf32>
    %20 = math.exp %19 : vector<1x128xf32>
    %cst_18 = arith.constant 1.000000e+00 : f32
    %21 = vector.broadcast %cst_18 : f32 to vector<1x128xf32>
    %22 = arith.addf %21, %20 : vector<1x128xf32>
    %23 = arith.divf %21, %22 : vector<1x128xf32>
    %24 = vector.broadcast %23 : vector<1x128xf32> to vector<8x128xf32>
    %25 = arith.mulf %24, %1 : vector<8x128xf32>
    %c0_19 = arith.constant 0 : index
    %c0_20 = arith.constant 0 : index
    %26 = vector.load %arg9[%c0_19, %c0_20] : memref<8x8xf32, #tpu.memory_space<vmem>>, vector<8x8xf32>
    %cst_21 = arith.constant dense<0.000000e+00> : vector<8x128xf32>
    %27 = tpu.matmul %26, %25, %cst_21 {dimension_numbers = #tpu.dot_dimension_numbers<[1], [0], [0], [1], [0, 0, 1, 1], [], []>} : vector<8x8xf32>, vector<8x128xf32>, vector<8x128xf32> -> vector<8x128xf32>
    %c0_22 = arith.constant 0 : index
    %c0_23 = arith.constant 0 : index
    %28 = vector.load %arg10[%c0_22, %c0_23] : memref<8x1xf32, #tpu.memory_space<vmem>>, vector<8x1xf32>
    %29 = vector.broadcast %28 : vector<8x1xf32> to vector<8x128xf32>
    %30 = arith.addf %27, %29 : vector<8x128xf32>
    %c0_24 = arith.constant 0 : index
    %c0_25 = arith.constant 0 : index
    %c0_26 = arith.constant 0 : index
    %31 = vector.load %arg11[%c0_24, %c0_25, %c0_26] : memref<1x8x128xf32, #tpu.memory_space<vmem>>, vector<1x8x128xf32>
    %32 = vector.shape_cast %31 : vector<1x8x128xf32> to vector<8x128xf32>
    %33 = vector.shape_cast %30 : vector<8x128xf32> to vector<1x8x128xf32>
    tpu.vector_store %arg11[%c0_24, %c0_25, %c0_26], %33 {strides = array<i32>} : memref<1x8x128xf32, #tpu.memory_space<vmem>>, vector<1x8x128xf32>,
    %c0_27 = arith.constant 0 : index
    %c0_28 = arith.constant 0 : index
    %c0_29 = arith.constant 0 : index
    %34 = vector.load %arg12[%c0_27, %c0_28, %c0_29] : memref<1x1x128xf32, #tpu.memory_space<vmem>>, vector<1x1x128xf32>
    %35 = vector.shape_cast %34 : vector<1x1x128xf32> to vector<1x128xf32>
    %36 = vector.shape_cast %23 : vector<1x128xf32> to vector<1x1x128xf32>
    tpu.vector_store %arg12[%c0_27, %c0_28, %c0_29], %36 {strides = array<i32>} : memref<1x1x128xf32, #tpu.memory_space<vmem>>, vector<1x1x128xf32>,
    %c0_i32 = arith.constant 0 : i32
    %37 = arith.cmpi eq, %arg0, %c0_i32 : i32
    %c0_i32_30 = arith.constant 0 : i32
    %38 = arith.cmpi eq, %arg1, %c0_i32_30 : i32
    %39 = arith.andi %37, %38 : i1
    %40 = arith.extui %39 : i1 to i32
    %c0_i32_31 = arith.constant 0 : i32
    %41 = arith.cmpi ne, %40, %c0_i32_31 : i32
    scf.if %41 {
      %cst_42 = arith.constant 0.000000e+00 : f32
      %51 = vector.broadcast %cst_42 : f32 to vector<8x1xf32>
      %c0_43 = arith.constant 0 : index
      %c0_44 = arith.constant 0 : index
      %52 = vector.load %arg13[%c0_43, %c0_44] : memref<8x1xf32, #tpu.memory_space<vmem>>, vector<8x1xf32>
      tpu.vector_store %arg13[%c0_43, %c0_44], %51 {strides = array<i32>} : memref<8x1xf32, #tpu.memory_space<vmem>>, vector<8x1xf32>,
      %cst_45 = arith.constant 0.000000e+00 : f32
      %53 = vector.broadcast %cst_45 : f32 to vector<8x8xf32>
      %c0_46 = arith.constant 0 : index
      %c0_47 = arith.constant 0 : index
      %54 = vector.load %arg14[%c0_46, %c0_47] : memref<8x8xf32, #tpu.memory_space<vmem>>, vector<8x8xf32>
      tpu.vector_store %arg14[%c0_46, %c0_47], %53 {strides = array<i32>} : memref<8x8xf32, #tpu.memory_space<vmem>>, vector<8x8xf32>,
    } else {
    }
    %c0_32 = arith.constant 0 : index
    %c0_33 = arith.constant 0 : index
    %42 = vector.load %arg13[%c0_32, %c0_33] : memref<8x1xf32, #tpu.memory_space<vmem>>, vector<8x1xf32>
    %cst_34 = arith.constant dense<0.000000e+00> : vector<8xf32>
    %43 = vector.multi_reduction <add>, %30, %cst_34 [1] : vector<8x128xf32> to vector<8xf32>
    %44 = vector.shape_cast %43 : vector<8xf32> to vector<8x1xf32>
    %45 = arith.addf %42, %44 : vector<8x1xf32>
    %c0_35 = arith.constant 0 : index
    %c0_36 = arith.constant 0 : index
    %46 = vector.load %arg13[%c0_35, %c0_36] : memref<8x1xf32, #tpu.memory_space<vmem>>, vector<8x1xf32>
    tpu.vector_store %arg13[%c0_35, %c0_36], %45 {strides = array<i32>} : memref<8x1xf32, #tpu.memory_space<vmem>>, vector<8x1xf32>,
    %c0_37 = arith.constant 0 : index
    %c0_38 = arith.constant 0 : index
    %47 = vector.load %arg14[%c0_37, %c0_38] : memref<8x8xf32, #tpu.memory_space<vmem>>, vector<8x8xf32>
    %cst_39 = arith.constant dense<0.000000e+00> : vector<8x8xf32>
    %48 = tpu.matmul %30, %30, %cst_39 {dimension_numbers = #tpu.dot_dimension_numbers<[1], [1], [0], [0], [0, 0, 1, 0], [], []>} : vector<8x128xf32>, vector<8x128xf32>, vector<8x8xf32> -> vector<8x8xf32>
    %49 = arith.addf %47, %48 : vector<8x8xf32>
    %c0_40 = arith.constant 0 : index
    %c0_41 = arith.constant 0 : index
    %50 = vector.load %arg14[%c0_40, %c0_41] : memref<8x8xf32, #tpu.memory_space<vmem>>, vector<8x8xf32>
    tpu.vector_store %arg14[%c0_40, %c0_41], %49 {strides = array<i32>} : memref<8x8xf32, #tpu.memory_space<vmem>>, vector<8x8xf32>,
    return
  }
  func.func @transform_0(%arg0: i32, %arg1: i32) -> (i32, i32, i32) {
    %c0_i32 = arith.constant 0 : i32
    %c0_i32_0 = arith.constant 0 : i32
    return %arg0, %c0_i32, %arg1 : i32, i32, i32
  }
  func.func @transform_1(%arg0: i32, %arg1: i32) -> (i32, i32, i32) {
    %c0_i32 = arith.constant 0 : i32
    %c0_i32_0 = arith.constant 0 : i32
    return %arg0, %c0_i32, %arg1 : i32, i32, i32
  }
  func.func @transform_2(%arg0: i32, %arg1: i32) -> (i32, i32) {
    %c0_i32 = arith.constant 0 : i32
    %c0_i32_0 = arith.constant 0 : i32
    %c0_i32_1 = arith.constant 0 : i32
    return %c0_i32, %c0_i32_0 : i32, i32
  }
  func.func @transform_3(%arg0: i32, %arg1: i32) -> (i32, i32) {
    %c0_i32 = arith.constant 0 : i32
    %c0_i32_0 = arith.constant 0 : i32
    %c0_i32_1 = arith.constant 0 : i32
    return %c0_i32, %c0_i32_0 : i32, i32
  }
  func.func @transform_4(%arg0: i32, %arg1: i32) -> (i32, i32) {
    %c0_i32 = arith.constant 0 : i32
    %c0_i32_0 = arith.constant 0 : i32
    %c0_i32_1 = arith.constant 0 : i32
    return %c0_i32, %c0_i32_0 : i32, i32
  }
  func.func @transform_5(%arg0: i32, %arg1: i32) -> (i32, i32) {
    %c0_i32 = arith.constant 0 : i32
    %c0_i32_0 = arith.constant 0 : i32
    %c0_i32_1 = arith.constant 0 : i32
    return %c0_i32, %c0_i32_0 : i32, i32
  }
  func.func @transform_6(%arg0: i32, %arg1: i32) -> (i32, i32) {
    %c0_i32 = arith.constant 0 : i32
    %c0_i32_0 = arith.constant 0 : i32
    %c0_i32_1 = arith.constant 0 : i32
    return %c0_i32, %c0_i32_0 : i32, i32
  }
  func.func @transform_7(%arg0: i32, %arg1: i32) -> (i32, i32) {
    %c0_i32 = arith.constant 0 : i32
    %c0_i32_0 = arith.constant 0 : i32
    %c0_i32_1 = arith.constant 0 : i32
    return %c0_i32, %c0_i32_0 : i32, i32
  }
  func.func @transform_8(%arg0: i32, %arg1: i32) -> (i32, i32) {
    %c0_i32 = arith.constant 0 : i32
    %c0_i32_0 = arith.constant 0 : i32
    %c0_i32_1 = arith.constant 0 : i32
    return %c0_i32, %c0_i32_0 : i32, i32
  }
  func.func @transform_9(%arg0: i32, %arg1: i32) -> (i32, i32, i32) {
    %c0_i32 = arith.constant 0 : i32
    %c0_i32_0 = arith.constant 0 : i32
    return %arg0, %c0_i32, %arg1 : i32, i32, i32
  }
  func.func @transform_10(%arg0: i32, %arg1: i32) -> (i32, i32, i32) {
    %c0_i32 = arith.constant 0 : i32
    %c0_i32_0 = arith.constant 0 : i32
    return %arg0, %c0_i32, %arg1 : i32, i32, i32
  }
  func.func @transform_11(%arg0: i32, %arg1: i32) -> (i32, i32) {
    %c0_i32 = arith.constant 0 : i32
    %c0_i32_0 = arith.constant 0 : i32
    %c0_i32_1 = arith.constant 0 : i32
    return %c0_i32, %c0_i32_0 : i32, i32
  }
  func.func @transform_12(%arg0: i32, %arg1: i32) -> (i32, i32) {
    %c0_i32 = arith.constant 0 : i32
    %c0_i32_0 = arith.constant 0 : i32
    %c0_i32_1 = arith.constant 0 : i32
    return %c0_i32, %c0_i32_0 : i32, i32
  }
}

module attributes {stable_mosaic.version = 11 : i64} {
  func.func @_pass2_kernel(%arg0: i32, %arg1: i32, %arg2: memref<1x8x128xf32, #tpu.memory_space<vmem>>, %arg3: memref<8x8xf32, #tpu.memory_space<vmem>>, %arg4: memref<8x1xf32, #tpu.memory_space<vmem>>, %arg5: memref<1x8x128xf32, #tpu.memory_space<vmem>>) attributes {dimension_semantics = [#tpu.dimension_semantics<parallel>, #tpu.dimension_semantics<parallel>], iteration_bounds = array<i64: 2, 2>, scalar_prefetch = 0 : i64, scratch_operands = 0 : i64, tpu.core_type = #tpu.core_type<tc>, window_params = [{transform_indices = @transform_0, window_bounds = array<i64: 1, 8, 128>}, {pipeline_mode = #tpu.pipeline_mode<synchronous>, transform_indices = @transform_1, window_bounds = array<i64: 8, 8>}, {pipeline_mode = #tpu.pipeline_mode<synchronous>, transform_indices = @transform_2, window_bounds = array<i64: 8, 1>}, {transform_indices = @transform_3, window_bounds = array<i64: 1, 8, 128>}]} {
    %c0 = arith.constant 0 : index
    %c0_0 = arith.constant 0 : index
    %0 = vector.load %arg3[%c0, %c0_0] : memref<8x8xf32, #tpu.memory_space<vmem>>, vector<8x8xf32>
    %c0_1 = arith.constant 0 : index
    %c0_2 = arith.constant 0 : index
    %c0_3 = arith.constant 0 : index
    %1 = vector.load %arg2[%c0_1, %c0_2, %c0_3] : memref<1x8x128xf32, #tpu.memory_space<vmem>>, vector<1x8x128xf32>
    %2 = vector.shape_cast %1 : vector<1x8x128xf32> to vector<8x128xf32>
    %cst = arith.constant dense<0.000000e+00> : vector<8x128xf32>
    %3 = tpu.matmul %0, %2, %cst {dimension_numbers = #tpu.dot_dimension_numbers<[1], [0], [0], [1], [0, 0, 1, 1], [], []>} : vector<8x8xf32>, vector<8x128xf32>, vector<8x128xf32> -> vector<8x128xf32>
    %c0_4 = arith.constant 0 : index
    %c0_5 = arith.constant 0 : index
    %4 = vector.load %arg4[%c0_4, %c0_5] : memref<8x1xf32, #tpu.memory_space<vmem>>, vector<8x1xf32>
    %5 = vector.broadcast %4 : vector<8x1xf32> to vector<8x128xf32>
    %6 = arith.addf %3, %5 : vector<8x128xf32>
    %cst_6 = arith.constant 0.000000e+00 : f32
    %7 = vector.broadcast %cst_6 : f32 to vector<8x128xf32>
    %8 = arith.maximumf %6, %7 : vector<8x128xf32>
    %c0_7 = arith.constant 0 : index
    %c0_8 = arith.constant 0 : index
    %c0_9 = arith.constant 0 : index
    %9 = vector.load %arg5[%c0_7, %c0_8, %c0_9] : memref<1x8x128xf32, #tpu.memory_space<vmem>>, vector<1x8x128xf32>
    %10 = vector.shape_cast %9 : vector<1x8x128xf32> to vector<8x128xf32>
    %11 = vector.shape_cast %8 : vector<8x128xf32> to vector<1x8x128xf32>
    tpu.vector_store %arg5[%c0_7, %c0_8, %c0_9], %11 {strides = array<i32>} : memref<1x8x128xf32, #tpu.memory_space<vmem>>, vector<1x8x128xf32>,
    return
  }
  func.func @transform_0(%arg0: i32, %arg1: i32) -> (i32, i32, i32) {
    %c0_i32 = arith.constant 0 : i32
    %c0_i32_0 = arith.constant 0 : i32
    return %arg0, %c0_i32, %arg1 : i32, i32, i32
  }
  func.func @transform_1(%arg0: i32, %arg1: i32) -> (i32, i32) {
    %c0_i32 = arith.constant 0 : i32
    %c0_i32_0 = arith.constant 0 : i32
    %c0_i32_1 = arith.constant 0 : i32
    return %c0_i32, %c0_i32_0 : i32, i32
  }
  func.func @transform_2(%arg0: i32, %arg1: i32) -> (i32, i32) {
    %c0_i32 = arith.constant 0 : i32
    %c0_i32_0 = arith.constant 0 : i32
    %c0_i32_1 = arith.constant 0 : i32
    return %c0_i32, %c0_i32_0 : i32, i32
  }
  func.func @transform_3(%arg0: i32, %arg1: i32) -> (i32, i32, i32) {
    %c0_i32 = arith.constant 0 : i32
    %c0_i32_0 = arith.constant 0 : i32
    return %arg0, %c0_i32, %arg1 : i32, i32, i32
  }
}

</mosaic_0001>

<bundles_post_ra>
// kernel: multi_attention_block.3
= control target key start
LH: loop header
LB: loop body
LE: loop exit
PB: predicated region body
PF: predicated region fallthrough
CT: control target
= control target key end

     0   :  { %s498_s12 = smov 0   ;;  %s500_s13 = smov 0   ;;  %s555_s0 = inlined_call_operand.vmem [shape: f32[2,8,256], index: 0, kind: input, shape index: {}]   ;;  %s556_s1 = inlined_call_operand.vmem [shape: f32[8,8], index: 1, kind: input, shape index: {}]   ;;  %s557_s2 = inlined_call_operand.vmem [shape: f32[8,1], index: 2, kind: input, shape index: {}]   ;;  %s558_s3 = inlined_call_operand.vmem [shape: f32[2,8,256], index: 3, kind: output, shape index: {}]  }
   0x1   :  { %s502_s14 = smov 0   ;;  %s504_s15 = smov 0  }
   0x2   :  { %s506_s16 = smov 0  }
   0x3 LB: > { %s22_s17 = sadd.s32 1, %s465_s14  ;;  %s25_s18 = sadd.s32 1, %s469_s15  ;;  %s473_s16 = sphi %s506_s16, %s13_s16   ;;  %s469_s15 = sphi %s504_s15, %s562_s15   ;;  %s465_s14 = sphi %s502_s14, %s561_s14   ;;  %s461_s13 = sphi %s500_s13, %s560_s13   ;;  %s457_s12 = sphi %s498_s12, %s559_s12  }
   0x4   : > { %p23_p0 = scmp.ge.s32.totalorder %s22_s17, 2  ;;  %p376_p1 = scmp.ge.s32.totalorder %s473_s16, 1 }
   0x5   : > { %p156_p2 = scmp.lt.s32.totalorder %s473_s16, 5 }
   0x6   : > { %s564_s17 = smov (%p23_p0, %s22_s17), 0  ;;  %s566_s18 = smov (!%p23_p0, %s25_s18), %s469_s15 }
   0x7   : > { %p157_p3 = pnand %p376_p1, %p156_p2  ;;  %p27_p4 = scmp.ge.s32.totalorder %s566_s18, 2 }
   0x8   : > { %p186_p5 = scmp.lt.s32.totalorder (!%p157_p3), %s461_s13, 1  ;;  %p188_p6 = scmp.lt.s32.totalorder (!%p157_p3), %s457_s12, 1  ;;  %v475_v0 = vmov (!%p157_p3), 0.0   ;;  %vm476_vm0 = vmmov (!%p157_p3), 0   ;;  %v204_v1 = vld [vmem:[%s557_s2] sm:$0xff] (!%p157_p3)  ;;  %v477_v2 = vmov (!%p157_p3), 0  }
   0x9   : > { %s568_s18 = smov (%p27_p4, %s566_s18), 0  ;;  %160 = sbr.rel (%p157_p3) target bundleno = 240 (0xf0), region = 32 }
   0xa   : > { %386 = vmatprep.subr.mxu0 (!%p157_p3), %v475_v0  ;;  %388 = vmatprep.mubr.msk.f32.mxu0 (!%p157_p3), %vm476_vm0, %v475_v0  ;;  %v202_v3 = vld [vmem:[%s556_s1] sm:$0xff] (!%p157_p3)  ;;  %vm210_vm1 = vcmask (!%p157_p3), 64512  }
   0xb   : > { %434 = vset.pattern.permute.xlu0 (!%p157_p3), %v477_v2 }
   0xc   : > { %207 = vperm.xlu0 (!%p157_p3), %434, %v204_v1  }
  0x10   : > { %s570_s13 = smov (!%p186_p5, %s461_s13), 1  ;;  %s572_s12 = smov (!%p188_p6, %s457_s12), 1 }
  0x11   : > { %s377_s21 = sshll.u32 %s570_s13, 1 }
  0x12   : > { %s191_s22 = sadd.s32 %s377_s21, %s572_s12 }
  0x13   : > { %s378_s23 = sshll.u32 %s191_s22, 3 }
  0x14   : > { %s193_s26 = scalar_lea.vmem %s555_s0, %s378_s23  ;;  %s201_s4 = scalar_lea.vmem %s558_s3, %s378_s23 }
  0x15   : > { %v203_v4 = vld [vmem:[%s193_s26] sm:$0xff] }
  0x16   : > { %387 = vmatpush3.msra.mxu0 %v203_v4 }
  0x17   : > { %389 = vmatmul.mubr.msk.f32.vlgmr.msra.gmra.mrb[0].mxu0 %vm210_vm1, %v202_v3 }
  0x8b   : > { %v208_v5 = vpop.permute.xlu0 %207 }
  0xea   : > { %v280_v6 = vpop.f32.mrb[0].mxu0 }
  0xeb   : > { %v281_v7 = vadd.f32 %v280_v6, %v208_v5  ;;  %v390_v8 = vpop.f32.mrb[1].mxu0 }
  0xed   : > { %v284_v9 = vmax.f32 %v281_v7, 0.0 }
  0xef   : > { %285 = vst [vmem:[%s201_s4] sm:$0xff] %v284_v9 }
  0xf0 PF: > { %s13_s16 = sadd.s32 1, %s473_s16   ;;  %s559_s12 = smov %s465_s14 }
  0xf1   : > { %p10_p7 = scmp.ge.s32.totalorder %s13_s16, 6   ;;  %s560_s13 = smov %s469_s15 }
  0xf2   : > { %s561_s14 = smov %s564_s17  ;;  %s562_s15 = smov %s568_s18 }
  0xf3   :  { %12 = sbr.rel (!%p10_p7) target bundleno = 3 (0x3), region = 62 }

// kernel: multi_attention_block.2
= control target key start
LH: loop header
LB: loop body
LE: loop exit
PB: predicated region body
PF: predicated region fallthrough
CT: control target
= control target key end

     0   :  { %s1534_s0 = inlined_call_operand.vmem [shape: f32[2,8,256], index: 0, kind: input, shape index: {}]   ;;  %s1535_s1 = inlined_call_operand.vmem [shape: f32[2,16,256], index: 1, kind: input, shape index: {}]   ;;  %s1536_s2 = inlined_call_operand.vmem [shape: f32[4,8], index: 2, kind: input, shape index: {}]   ;;  %s1537_s3 = inlined_call_operand.vmem [shape: f32[4,16], index: 3, kind: input, shape index: {}]   ;;  %s1538_s4 = inlined_call_operand.vmem [shape: f32[4,1], index: 4, kind: input, shape index: {}]   ;;  %s1539_s5 = inlined_call_operand.vmem [shape: f32[1,4], index: 5, kind: input, shape index: {}]   ;;  %s1540_s6 = inlined_call_operand.<no memory space> [shape: f32[1,1], index: 6, kind: input, shape index: {}]   ;;  %s1541_s7 = inlined_call_operand.vmem [shape: f32[8,8], index: 7, kind: input, shape index: {}]   ;;  %s1542_s8 = inlined_call_operand.vmem [shape: f32[8,1], index: 8, kind: input, shape index: {}]   ;;  %s1543_s9 = inlined_call_operand.vmem [shape: f32[2,8,256], index: 9, kind: output, shape index: {0}]   ;;  %s1544_s10 = inlined_call_operand.vmem [shape: f32[2,1,256], index: 10, kind: output, shape index: {1}]   ;;  %s1545_s11 = inlined_call_operand.vmem [shape: f32[8,1], index: 11, kind: output, shape index: {2}]   ;;  %s1546_s12 = inlined_call_operand.vmem [shape: f32[8,8], index: 12, kind: output, shape index: {3}]  }
   0x1   :  { %1549 = sst [smem:[#allocation5_spill]] %s1546_s12  ;;  %v18_v0 = vstv %s1540_s6 }
   0x2   :  { %19 = vst [vmem:[#allocation2] sm:$0x1] %v18_v0 }
   0x3   :  { %s1373_s23 = smov 0   ;;  %s1375_s24 = smov 0  }
   0x4   :  { %s1377_s25 = smov 0   ;;  %s1379_s26 = smov 0  }
   0x5   :  { %s1381_s27 = smov 0   ;;  %s1383_s28 = smov 0  }
   0x6   :  { %s1385_s29 = smov 0  }
   0x7 LB: > { %s34_s6 = sadd.s32 1, %s1290_s27  ;;  %s37_s30 = sadd.s32 1, %s1294_s28  ;;  %s1298_s29 = sphi %s1385_s29, %s25_s29   ;;  %s1294_s28 = sphi %s1383_s28, %s1559_s28   ;;  %s1290_s27 = sphi %s1381_s27, %s1558_s27   ;;  %s1286_s26 = sphi %s1379_s26, %s1557_s26   ;;  %s1282_s25 = sphi %s1377_s25, %s1556_s25   ;;  %s1278_s24 = sphi %s1375_s24, %s1555_s24   ;;  %s1274_s23 = sphi %s1373_s23, %s1554_s23  }
   0x8   : > { %p35_p0 = scmp.ge.s32.totalorder %s34_s6, 2  ;;  %p81_p1 = scmp.ne.s32.totalorder %s1278_s24, %s1274_s23 }
   0x9   : > { %p82_p2 = scmp.eq.s32.totalorder %s1298_s29, 0  ;;  %s74_s16 = sadd.s32 1, %s1278_s24 }
   0xa   : > { %s1561_s6 = smov (%p35_p0, %s34_s6), 0  ;;  %s1563_s30 = smov (!%p35_p0, %s37_s30), %s1294_s28 }
   0xb   : > { %1550 = sst [smem:[#allocation4_spill]] %s1561_s6  ;;  %p83_p3 = por %p82_p2, %p81_p1 }
   0xc   : > { %p39_p4 = scmp.ge.s32.totalorder %s1563_s30, 2  ;;  %s70_s13 = ssub.s32 %s1290_s27, %s1561_s6 }
   0xd   : > { %p1114_p6 = scmp.ge.s32.totalorder %s1298_s29, 4 }
   0xe   : > { %s1565_s30 = smov (%p39_p4, %s1563_s30), 0 }
   0xf   : > { %s69_s14 = ssub.s32 %s1294_s28, %s1565_s30  ;;  %373 = sbr.rel (%p1114_p6) target bundleno = 29 (0x1d), region = 44 }
  0x10   : > { %s71_s15 = sor.u32 %s70_s13, %s69_s14 }
  0x11   : > { %p72_p5 = scmp.eq.s32.totalorder %s71_s15, 0 }
  0x13   : > { %s1424_s17 = scalar_select %p72_p5, %s1278_s24, %s74_s16  }
  0x16   : > { %387 = sbr.rel (!%p83_p3) target bundleno = 29 (0x1d), region = 52  ;;  %s389_s18 = sand.u32 (%p83_p3), 1, %s1278_s24  }
  0x17   : > { %s1116_s19 = sshll.u32 (%p83_p3), %s1294_s28, 2  ;;  %s1115_s20 = sshll.u32 (%p83_p3), %s389_s18, 4 }
  0x18   : > { %s393_s21 = sadd.s32 (%p83_p3), %s1290_s27, %s1116_s19  ;;  %s391_s14 = scalar_lea.vmem (%p83_p3), [#allocation3], %s1115_s20 }
  0x19   : > { %s1117_s22 = sshll.u32 (%p83_p3), %s393_s21, 3 }
  0x1a   : > { %s395_s13 = scalar_lea.vmem (%p83_p3), %s1535_s1, %s1117_s22 }
  0x1b   : > { %v425_v1 = vld [vmem:[%s395_s13] sm:$0xff] (%p83_p3)  ;;  %v427_v2 = vld [vmem:[%s395_s13 + $0x10] sm:$0xff] (%p83_p3) }
  0x1c   : > { %426 = vst [vmem:[%s391_s14] sm:$0xff] (%p83_p3), %v425_v1  ;;  %428 = vst [vmem:[%s391_s14 + $0x8] sm:$0xff] (%p83_p3), %v427_v2 }
  0x1d PF: > { %p1118_p7 = scmp.ge.s32.totalorder %s1298_s29, 1  ;;  %p433_p8 = scmp.lt.s32.totalorder %s1298_s29, 5 }
  0x1f   : > { %p434_p9 = pnand %p1118_p7, %p433_p8 }
  0x20   : > { %s440_s15 = sand.u32 (!%p434_p9), 1, %s1274_s23   ;;  %v1300_v3 = vmov (!%p434_p9), 0.0|0.0   ;;  %vm1301_vm0 = vmmov (!%p434_p9), 0   ;;  %v1302_v4 = vmov (!%p434_p9), 0.0   ;;  %p499_p10 = scmp.lt.s32.totalorder (!%p434_p9), %s1286_s26, 1  ;;  %v1303_v8 = vmov (!%p434_p9), 0  }
  0x21   : > { %437 = sbr.rel (%p434_p9) target bundleno = 945 (0x3b1), region = 90  ;;  %1171 = vmatprep.subr.bf16.mxu0 (!%p434_p9), %v1300_v3  ;;  %s1119_s12 = sshll.u32 (!%p434_p9), %s440_s15, 4  ;;  %1148 = vmatprep.mubr.msk.f32.mxu0 (!%p434_p9), %vm1301_vm0, %v1302_v4  ;;  %v527_v5 = vld [vmem:[%s1538_s4] sm:$0xf] (!%p434_p9)  ;;  %vm533_vm1 = vcmask (!%p434_p9), 130048   ;;  %vm607_vm2 = vcmask (!%p434_p9), 64512   ;;  %v689_v21 = vlaneseq (!%p434_p9) }
  0x22   : > { %p501_p11 = scmp.lt.s32.totalorder (!%p434_p9), %s1282_s25, 1  ;;  %1156 = vmatprep.subr.mxu1 (!%p434_p9), %v1302_v4  ;;  %1158 = vmatprep.mubr.msk.f32.mxu1 (!%p434_p9), %vm1301_vm0, %v1302_v4  ;;  %s442_s23 = scalar_lea.vmem (!%p434_p9), [#allocation3], %s1119_s12  ;;  %v683_v10 = vld [vmem:[#allocation2] sm:$0x1] (!%p434_p9)  ;;  %vm697_vm3 = vcmask (!%p434_p9), 1043456   ;;  %vm693_vm4 = vcmask (!%p434_p9), 31744  }
  0x23   : > { %v523_v6 = vld [vmem:[%s442_s23] sm:$0xff] (!%p434_p9)  ;;  %v524_v7 = vld [vmem:[%s442_s23 + $0x8] sm:$0xff] (!%p434_p9)  ;;  %1238 = vset.pattern.permute.xlu0 (!%p434_p9), %v1303_v8  ;;  %1239 = vset.pattern.permute.xlu1 (!%p434_p9), %v1303_v8  ;;  %v690_v22 = vshrl.u32 (!%p434_p9), %v689_v21, 7  ;;  %p864_p12 = scmp.eq.s32.totalorder (!%p434_p9), %s1286_s26, 0  ;;  %p865_p13 = scmp.eq.s32.totalorder (!%p434_p9), %s1282_s25, 0 }
  0x24   : > { %v1172_v9 = vpack.c.bf16 (!%p434_p9), %v524_v7, %v523_v6  ;;  %530 = vperm.xlu0 (!%p434_p9), %1238, %v527_v5   ;;  %v526_v11 = vld [vmem:[%s1537_s3] sm:$0xf] (!%p434_p9) }
  0x25   : > { %v525_v13 = vld [vmem:[%s1536_s2] sm:$0xf] (!%p434_p9)  ;;  %v691_v23 = vsub.s32 (!%p434_p9), 0, %v690_v22  ;;  %p866_p0 = pnand (!%p434_p9), %p865_p13, %p864_p12 }
  0x26   : > { %1173 = vmatpush3.bf16.msra.mxu0 (!%p434_p9), %v1172_v9  ;;  %v682_v19 = vld [vmem:[%s1539_s5] sm:$0x1] (!%p434_p9) }
  0x27   : > { %1151 = vmatprep.subr.mxu0 (!%p434_p9), %v1302_v4  ;;  %v783_v20 = vld [vmem:[%s1542_s8] sm:$0xff] (!%p434_p9) }
  0x28   : > { %s500_s18 = scalar_select %p499_p10, %s1286_s26, 1  ;;  %686 = vperm.xlu0 %1238, %v683_v10   ;;  %786 = vperm.xlu1 %1239, %v783_v20   ;;  %v782_v35 = vld [vmem:[%s1541_s7] sm:$0xff] }
  0x29   : > { %s502_s19 = scalar_select %p501_p11, %s1282_s25, 1  ;;  %1149 = vmatmul.mubr.msk.f32.vlgmr.msra.gmra.mrb[0].mxu0 %vm533_vm1, %v526_v11 }
  0x2a   : > { %s1120_s20 = sshll.u32 %s500_s18, 1  ;;  %1153 = vmatprep.mubr.msk.f32.mxu0 %vm1301_vm0, %v1302_v4  ;;  %vm870_vm5 = vcmask (!%p866_p0), 7168   ;;  %v1304_v40 = vmov (!%p866_p0), 0.0   ;;  %s1551_s22 = sld [smem:[#allocation5_spill]] (!%p866_p0) }
  0x2b   : > { %s1451_s13 = sadd.s32 %s1120_s20, %s502_s19  ;;  %871 = vst.msk [vmem:[%s1545_s11] sm:$0xff] (!%p866_p0), %vm870_vm5, %v1304_v40 }
  0x2c   : > { %s1121_s14 = sshll.u32 %s1451_s13, 3  ;;  %s521_s12 = scalar_lea.vmem %s1544_s10, %s1451_s13 }
  0x2d   : > { %s506_s6 = scalar_lea.vmem %s1534_s0, %s1121_s14  ;;  %s514_s19 = scalar_lea.vmem %s1543_s9, %s1121_s14 }
  0x2e   : > { %v522_v12 = vld [vmem:[%s506_s6] sm:$0xff] }
  0x2f   : > { %1152 = vmatpush3.msra.mxu0 %v522_v12 }
  0x30   : > { %872 = vst.msk [vmem:[%s1551_s22] sm:$0xff] (!%p866_p0), %vm607_vm2, %v1304_v40 }
  0x31   : > { %1154 = vmatmul.mubr.msk.f32.vlgmr.msra.gmra.mrb[0].mxu0 %vm607_vm2, %v525_v13 }
  0xa3   : > { %v531_v14 = vpop.permute.xlu0 %530 }
  0xa7   : > { %v687_v24 = vpop.permute.xlu0 %686  ;;  %v787_v36 = vpop.permute.xlu1 %786 }
  0xa8   : > { %v692_v25 = vrot.slane %v687_v24, %v691_v23 }
 0x104   : > { %v677_v15 = vpop.f32.mrb[0].mxu0 }
 0x105   : > { %v1174_v16 = vadd.f32 %v677_v15, %v531_v14  ;;  %v1155_v17 = vpop.f32.mrb[1].mxu0 }
 0x107   : > { %v681_v18 = vmax.f32 %v1174_v16, 0.0 }
 0x109   : > { %1157 = vmatpush3.msk.msra.mxu1 %vm697_vm3, %v681_v18 }
 0x10a   : > { %1159 = vmatmul.mubr.msk.f32.vlgmr.msra.gmra.mrb[0].mxu1 %vm693_vm4, %v682_v19  ;;  %1161 = vmatprep.subr.mxu1 %v1302_v4 }
 0x10b   : > { %1163 = vmatprep.mubr.msk.f32.mxu1 %vm1301_vm0, %v1302_v4 }
 0x1dd   : > { %v767_v26 = vpop.f32.mrb[0].mxu1 }
 0x1de   : > { %v768_v27 = vadd.f32 %v767_v26, %v692_v25  ;;  %v1160_v28 = vpop.f32.mrb[1].mxu1 }
 0x1e0   : > { %v1129_v29 = vmul.f32 -1.442695, %v768_v27 }
 0x1e2   : > { %1240 = vpow2.f32 %v1129_v29 }
 0x1ec   : > { %v1241_v30 = vpop.eup %1240 }
 0x1ed   : > { %v774_v31 = vadd.f32 1.0, %v1241_v30 }
 0x1ef   : > { %1242 = vrcp.f32 %v774_v31 }
 0x1f9   : > { %v1243_v32 = vpop.eup %1242 }
 0x1fa   : > { %863 = vst [vmem:[%s521_s12] sm:$0x1] %v1243_v32  ;;  %v780_v33 = vrot.slane %v1243_v32, %v691_v23 }
 0x1fc   : > { %v781_v34 = vmul.f32 %v780_v33, %v522_v12 }
 0x1fe   : > { %1162 = vmatpush3.msra.mxu1 %v781_v34 }
 0x1ff   : > { %1164 = vmatmul.mubr.msk.f32.vlgmr.msra.gmra.mrb[2].mxu1 %vm607_vm2, %v782_v35 }
 0x2cf   : > { %869 = sbr.rel (%p866_p0) target bundleno = 726 (0x2d6), region = 98 }
 0x2d2   : > { %v858_v37 = vpop.f32.mrb[2].mxu1 }
 0x2d3   : > { %v859_v38 = vadd.f32 %v858_v37, %v787_v36  ;;  %v1165_v39 = vpop.f32.mrb[3].mxu1 }
 0x2d5   : > { %862 = vst [vmem:[%s514_s19] sm:$0xff] %v859_v38 }
 0x2d6 PF: > { %1166 = vmatprep.subr.mxu1 %v1302_v4  ;;  %1168 = vmatprep.mubr.msk.f32.mxu1 %vm1301_vm0, %v1302_v4  ;;  %v873_v41 = vld [vmem:[%s1545_s11] sm:$0xff]  ;;  %vm877_vm6 = vcmask 7168   ;;  %s1552_s23 = sld [smem:[#allocation5_spill]] }
 0x2d7   : > { %1167 = vmatpush3.xpose.msra.mxu1 %v859_v38  ;;  %874 = vadd.xlane.f32.xlu0 %v859_v38 }
 0x2da   : > { %1169 = vmatmul.mubr.f32.vlgmr.msra.gmra.mrb[4].mxu1 %v859_v38 }
 0x2dc   : > { %v879_v44 = vld [vmem:[%s1552_s23] sm:$0xff] }
 0x364   : > { %v875_v42 = vpop.xlane.xlu0 %874 }
 0x365   : > { %v876_v43 = vadd.f32 %v875_v42, %v873_v41 }
 0x367   : > { %878 = vst.msk [vmem:[%s1545_s11] sm:$0xff] %vm877_vm6, %v876_v43 }
 0x3ad   : > { %v946_v45 = vpop.f32.mrb[4].mxu1 }
 0x3ae   : > { %v950_v46 = vadd.f32 %v946_v45, %v879_v44  ;;  %v1170_v47 = vpop.f32.mrb[5].mxu1 }
 0x3b0   : > { %951 = vst.msk [vmem:[%s1552_s23] sm:$0xff] %vm607_vm2, %v950_v46 }
 0x3b1 PF: > { %s25_s29 = sadd.s32 1, %s1298_s29   ;;  %s1553_s20 = sld [smem:[#allocation4_spill]] }
 0x3b2   : > { %p22_p1 = scmp.ge.s32.totalorder %s25_s29, 6   ;;  %s1554_s23 = smov %s1278_s24 }
 0x3b3   : > { %s1555_s24 = smov %s1424_s17  ;;  %s1556_s25 = smov %s1290_s27 }
 0x3b4   : > { %s1557_s26 = smov %s1294_s28  ;;  %s1559_s28 = smov %s1565_s30 }
 0x3b5   :  { %24 = sbr.rel (!%p22_p1) target bundleno = 7 (0x7), region = 164 }
 0x3b7   : > { %s1558_s27 = smov %s1553_s20 }

</bundles_post_ra>
